<compile_context>
chip_gen: v7x
topology: tpu7x:2x2x1
jax: 0.10.0
libtpu: 0.0.40
codegen_flags: <defaults>
</compile_context>

<pallas_src>
import functools

import jax
import jax.numpy as jnp
from jax.experimental import pallas as pl
from jax.experimental.pallas import tpu as pltpu


# ---------------------------------------------------------------------------
# Pallas kernel: fused-tap conv matmuls + running max + deferred bias/ReLU
# ---------------------------------------------------------------------------
def _char_cnn_kernel(x_ref, w_ref, b_ref, out_ref, *,
                     d_in, kernel_size, padding, l_in, matmul_dtype):
    """One row-block of the Char_CNN forward.

    x_ref  : [R, l_in*d_in]     token rows, (char position, channel) flattened
    w_ref  : [k*d_in, d_out_p]  fused conv taps (tap-major rows), lane-padded
    b_ref  : [1, d_out_p]       conv bias (f32), zero-padded lanes
    out_ref: [R, d_out_p]       relu(max-pool(conv)) per token row
    """
    l_out = l_in + 2 * padding - kernel_size + 1
    rows = x_ref.shape[0]
    d_out_p = w_ref.shape[1]

    # Single load + single cast of the x tile; bf16 cast done in-kernel so the
    # wrapper never makes an extra HBM pass over x.
    x = x_ref[...].astype(matmul_dtype)          # [R, l_in*d_in]
    w = w_ref[...]                               # [k*d_in, d_out_p]

    # Running max over conv output positions. Bias/ReLU are deferred past the
    # max (exact: bias is position-invariant and ReLU is monotone).
    m = None
    for t in range(l_out):                       # static, small -> fully unrolled
        lo = t - padding                         # first original char pos of window
        v_lo = max(lo, 0)                        # clip to the valid char range;
        v_hi = min(lo + kernel_size, l_in)       # clipped taps hit zero padding
        if v_hi <= v_lo:                         # window entirely inside padding
            c = jnp.zeros((rows, d_out_p), jnp.float32)
        else:
            xs = x[:, v_lo * d_in:v_hi * d_in]                 # [R, nv*d_in]
            ws = w[(v_lo - lo) * d_in:(v_hi - lo) * d_in, :]   # matching weight rows
            c = jnp.dot(xs, ws, preferred_element_type=jnp.float32)
        m = c if m is None else jnp.maximum(m, c)

    # One cheap VPU pass on the small pooled tensor; lane-dense store.
    out_ref[...] = jnp.maximum(m + b_ref[...], 0.0).astype(out_ref.dtype)


# ---------------------------------------------------------------------------
# Wrapper: layout glue + tiled pallas_call
# ---------------------------------------------------------------------------
def _pick_row_block(n_rows, target=1024):
    """Multiple-of-8 row block <= target, preferring >=2 grid programs and an
    exact divisor of n_rows (so no row padding is needed)."""
    blk = min(target, n_rows)
    if n_rows > 8:                                # keep >= 2 programs (v7x 2 TCs)
        blk = min(blk, -(-n_rows // 2))
    blk = max(8, (blk // 8) * 8)
    for cand in range(blk, 7, -8):                # nearby exact divisor if any
        if n_rows % cand == 0:
            return cand
    return blk


def char_cnn_forward(params, x, *, kernel_size, padding,
                     row_block=None, matmul_dtype=jnp.bfloat16):
    """Char_CNN forward: x [B, S, L, d_in] -> [B, S, d_out]."""
    B, S, L, d_in = x.shape
    w = params["w"]                               # [d_out, d_in, k] (PyTorch Conv1d)
    b = params["b"]                               # [d_out]
    d_out = w.shape[0]
    assert w.shape == (d_out, d_in, kernel_size)
    l_out = L + 2 * padding - kernel_size + 1
    assert l_out >= 1

    # TODO(synk): nn.Dropout is treated as identity (inference / eval mode only).

    # Natural row-major layout: free reshape, no pad/transpose HBM pass over x.
    N = B * S
    x2d = x.reshape(N, L * d_in)

    if row_block is None:
        row_block = _pick_row_block(N)
    n_pad = (-N) % row_block
    if n_pad:                                      # only for awkward B*S
        x2d = jnp.pad(x2d, ((0, n_pad), (0, 0)))
    n_rows = N + n_pad

    # Fused conv weights: [d_out, d_in, k] -> [k*d_in, d_out], lane-padded to 128
    # (better MXU N-fill + lane-dense output); bias padded with zeros.
    d_out_p = -(-d_out // 128) * 128
    w_fused = jnp.transpose(w, (2, 1, 0)).reshape(kernel_size * d_in, d_out)
    w_fused = jnp.pad(w_fused, ((0, 0), (0, d_out_p - d_out))).astype(matmul_dtype)
    b_row = jnp.pad(b.reshape(1, d_out).astype(jnp.float32),
                    ((0, 0), (0, d_out_p - d_out)))

    kernel = functools.partial(
        _char_cnn_kernel, d_in=d_in, kernel_size=kernel_size,
        padding=padding, l_in=L, matmul_dtype=matmul_dtype)

    out = pl.pallas_call(
        kernel,
        out_shape=jax.ShapeDtypeStruct((n_rows, d_out_p), jnp.float32),
        grid_spec=pltpu.PrefetchScalarGridSpec(
            num_scalar_prefetch=0,
            grid=(n_rows // row_block,),
            in_specs=[
                pl.BlockSpec((row_block, L * d_in), lambda i: (i, 0)),
                pl.BlockSpec((kernel_size * d_in, d_out_p), lambda i: (0, 0)),
                pl.BlockSpec((1, d_out_p), lambda i: (0, 0)),
            ],
            out_specs=pl.BlockSpec((row_block, d_out_p), lambda i: (i, 0)),
        ),
        compiler_params=pltpu.CompilerParams(
            dimension_semantics=("parallel",),        # rows independent -> megacore
            vmem_limit_bytes=32 * 1024 * 1024,        # safe on v5e/v6e/v7x, >> usage
        ),
    )(x2d, w_fused, b_row)

    return out[:N, :d_out].reshape(B, S, d_out)


# ---------------------------------------------------------------------------
# Pure-JAX reference (for correctness check)
# ---------------------------------------------------------------------------
def char_cnn_reference(params, x, *, kernel_size, padding):
    w = params["w"]                               # [d_out, d_in, k]
    b = params["b"]                               # [d_out]
    xp = jnp.pad(x, ((0, 0), (0, 0), (padding, padding), (0, 0)))
    Lp = xp.shape[2]
    L_out = Lp - kernel_size + 1
    windows = jnp.stack(
        [xp[:, :, t:t + kernel_size, :] for t in range(L_out)], axis=2
    )                                                       # [B, S, L_out, k, d_in]
    conv = jnp.einsum("bstkc,ock->bsto", windows, w) + b    # [B, S, L_out, d_out]
    return jnp.max(jax.nn.relu(conv), axis=2)               # [B, S, d_out]


if __name__ == "__main__":
    B, S, L = 2, 8, 16          # batch, seq_len, char_len
    d_in, d_out = 16, 32
    kernel_size, padding = 3, 1

    key = jax.random.PRNGKey(0)
    kx, kw, kb = jax.random.split(key, 3)
    x = jax.random.normal(kx, (B, S, L, d_in), jnp.float32)
    params = {
        "w": 0.1 * jax.random.normal(kw, (d_out, d_in, kernel_size), jnp.float32),
        "b": 0.1 * jax.random.normal(kb, (d_out,), jnp.float32),
    }

    ref = char_cnn_reference(params, x, kernel_size=kernel_size, padding=padding)

    # f32-operand path: parity with the f32 reference.
    out_f32 = char_cnn_forward(params, x, kernel_size=kernel_size, padding=padding,
                               matmul_dtype=jnp.float32)
    out_f32 = jax.block_until_ready(out_f32)
    assert out_f32.shape == (B, S, d_out)
    assert bool(jnp.all(jnp.isfinite(out_f32)))
    assert jnp.allclose(out_f32, ref, atol=1e-5, rtol=1e-5), \
        float(jnp.max(jnp.abs(out_f32 - ref)))

    # Default bf16-operand / f32-accumulate path (v6e / v7x MXU peak).
    out_bf16 = char_cnn_forward(params, x, kernel_size=kernel_size, padding=padding)
    out_bf16 = jax.block_until_ready(out_bf16)
    assert bool(jnp.all(jnp.isfinite(out_bf16)))
    assert jnp.allclose(out_bf16, ref, atol=5e-2, rtol=5e-2), \
        float(jnp.max(jnp.abs(out_bf16 - ref)))

    print("KERNEL_OK")
</pallas_src>

<mosaic_0001>
module attributes {stable_mosaic.version = 11 : i64} {
  func.func @_char_cnn_kernel(%arg0: i32, %arg1: memref<8x256xf32, #tpu.memory_space<vmem>>, %arg2: memref<48x128xf32, #tpu.memory_space<vmem>>, %arg3: memref<1x128xf32, #tpu.memory_space<vmem>>, %arg4: memref<8x128xf32, #tpu.memory_space<vmem>>) attributes {dimension_semantics = [#tpu.dimension_semantics<parallel>], iteration_bounds = array<i64: 2>, scalar_prefetch = 0 : i64, scratch_operands = 0 : i64, tpu.core_type = #tpu.core_type<tc>, window_params = [{transform_indices = @transform_0, window_bounds = array<i64: 8, 256>}, {pipeline_mode = #tpu.pipeline_mode<synchronous>, transform_indices = @transform_1, window_bounds = array<i64: 48, 128>}, {pipeline_mode = #tpu.pipeline_mode<synchronous>, transform_indices = @transform_2, window_bounds = array<i64: 1, 128>}, {transform_indices = @transform_3, window_bounds = array<i64: 8, 128>}]} {
    %c0 = arith.constant 0 : index
    %c0_0 = arith.constant 0 : index
    %0 = vector.load %arg1[%c0, %c0_0] : memref<8x256xf32, #tpu.memory_space<vmem>>, vector<8x256xf32>
    %c0_1 = arith.constant 0 : index
    %c0_2 = arith.constant 0 : index
    %1 = vector.load %arg2[%c0_1, %c0_2] : memref<48x128xf32, #tpu.memory_space<vmem>>, vector<48x128xf32>
    %2 = vector.extract_strided_slice %0 {offsets = [0, 0], sizes = [8, 32], strides = [1, 1]} : vector<8x256xf32> to vector<8x32xf32>
    %3 = vector.extract_strided_slice %1 {offsets = [16, 0], sizes = [32, 128], strides = [1, 1]} : vector<48x128xf32> to vector<32x128xf32>
    %cst = arith.constant dense<0.000000e+00> : vector<8x128xf32>
    %4 = tpu.matmul %2, %3, %cst {dimension_numbers = #tpu.dot_dimension_numbers<[1], [0], [0], [1], [0, 0, 1, 1], [], []>} : vector<8x32xf32>, vector<32x128xf32>, vector<8x128xf32> -> vector<8x128xf32>
    %5 = vector.extract_strided_slice %0 {offsets = [0, 0], sizes = [8, 48], strides = [1, 1]} : vector<8x256xf32> to vector<8x48xf32>
    %cst_3 = arith.constant dense<0.000000e+00> : vector<8x128xf32>
    %6 = tpu.matmul %5, %1, %cst_3 {dimension_numbers = #tpu.dot_dimension_numbers<[1], [0], [0], [1], [0, 0, 1, 1], [], []>} : vector<8x48xf32>, vector<48x128xf32>, vector<8x128xf32> -> vector<8x128xf32>
    %7 = arith.maximumf %4, %6 : vector<8x128xf32>
    %8 = vector.extract_strided_slice %0 {offsets = [0, 16], sizes = [8, 48], strides = [1, 1]} : vector<8x256xf32> to vector<8x48xf32>
    %cst_4 = arith.constant dense<0.000000e+00> : vector<8x128xf32>
    %9 = tpu.matmul %8, %1, %cst_4 {dimension_numbers = #tpu.dot_dimension_numbers<[1], [0], [0], [1], [0, 0, 1, 1], [], []>} : vector<8x48xf32>, vector<48x128xf32>, vector<8x128xf32> -> vector<8x128xf32>
    %10 = arith.maximumf %7, %9 : vector<8x128xf32>
    %11 = vector.extract_strided_slice %0 {offsets = [0, 32], sizes = [8, 48], strides = [1, 1]} : vector<8x256xf32> to vector<8x48xf32>
    %cst_5 = arith.constant dense<0.000000e+00> : vector<8x128xf32>
    %12 = tpu.matmul %11, %1, %cst_5 {dimension_numbers = #tpu.dot_dimension_numbers<[1], [0], [0], [1], [0, 0, 1, 1], [], []>} : vector<8x48xf32>, vector<48x128xf32>, vector<8x128xf32> -> vector<8x128xf32>
    %13 = arith.maximumf %10, %12 : vector<8x128xf32>
    %14 = vector.extract_strided_slice %0 {offsets = [0, 48], sizes = [8, 48], strides = [1, 1]} : vector<8x256xf32> to vector<8x48xf32>
    %cst_6 = arith.constant dense<0.000000e+00> : vector<8x128xf32>
    %15 = tpu.matmul %14, %1, %cst_6 {dimension_numbers = #tpu.dot_dimension_numbers<[1], [0], [0], [1], [0, 0, 1, 1], [], []>} : vector<8x48xf32>, vector<48x128xf32>, vector<8x128xf32> -> vector<8x128xf32>
    %16 = arith.maximumf %13, %15 : vector<8x128xf32>
    %17 = vector.extract_strided_slice %0 {offsets = [0, 64], sizes = [8, 48], strides = [1, 1]} : vector<8x256xf32> to vector<8x48xf32>
    %cst_7 = arith.constant dense<0.000000e+00> : vector<8x128xf32>
    %18 = tpu.matmul %17, %1, %cst_7 {dimension_numbers = #tpu.dot_dimension_numbers<[1], [0], [0], [1], [0, 0, 1, 1], [], []>} : vector<8x48xf32>, vector<48x128xf32>, vector<8x128xf32> -> vector<8x128xf32>
    %19 = arith.maximumf %16, %18 : vector<8x128xf32>
    %20 = vector.extract_strided_slice %0 {offsets = [0, 80], sizes = [8, 48], strides = [1, 1]} : vector<8x256xf32> to vector<8x48xf32>
    %cst_8 = arith.constant dense<0.000000e+00> : vector<8x128xf32>
    %21 = tpu.matmul %20, %1, %cst_8 {dimension_numbers = #tpu.dot_dimension_numbers<[1], [0], [0], [1], [0, 0, 1, 1], [], []>} : vector<8x48xf32>, vector<48x128xf32>, vector<8x128xf32> -> vector<8x128xf32>
    %22 = arith.maximumf %19, %21 : vector<8x128xf32>
    %23 = vector.extract_strided_slice %0 {offsets = [0, 96], sizes = [8, 48], strides = [1, 1]} : vector<8x256xf32> to vector<8x48xf32>
    %cst_9 = arith.constant dense<0.000000e+00> : vector<8x128xf32>
    %24 = tpu.matmul %23, %1, %cst_9 {dimension_numbers = #tpu.dot_dimension_numbers<[1], [0], [0], [1], [0, 0, 1, 1], [], []>} : vector<8x48xf32>, vector<48x128xf32>, vector<8x128xf32> -> vector<8x128xf32>
    %25 = arith.maximumf %22, %24 : vector<8x128xf32>
    %26 = vector.extract_strided_slice %0 {offsets = [0, 112], sizes = [8, 48], strides = [1, 1]} : vector<8x256xf32> to vector<8x48xf32>
    %cst_10 = arith.constant dense<0.000000e+00> : vector<8x128xf32>
    %27 = tpu.matmul %26, %1, %cst_10 {dimension_numbers = #tpu.dot_dimension_numbers<[1], [0], [0], [1], [0, 0, 1, 1], [], []>} : vector<8x48xf32>, vector<48x128xf32>, vector<8x128xf32> -> vector<8x128xf32>
    %28 = arith.maximumf %25, %27 : vector<8x128xf32>
    %29 = vector.extract_strided_slice %0 {offsets = [0, 128], sizes = [8, 48], strides = [1, 1]} : vector<8x256xf32> to vector<8x48xf32>
    %cst_11 = arith.constant dense<0.000000e+00> : vector<8x128xf32>
    %30 = tpu.matmul %29, %1, %cst_11 {dimension_numbers = #tpu.dot_dimension_numbers<[1], [0], [0], [1], [0, 0, 1, 1], [], []>} : vector<8x48xf32>, vector<48x128xf32>, vector<8x128xf32> -> vector<8x128xf32>
    %31 = arith.maximumf %28, %30 : vector<8x128xf32>
    %32 = vector.extract_strided_slice %0 {offsets = [0, 144], sizes = [8, 48], strides = [1, 1]} : vector<8x256xf32> to vector<8x48xf32>
    %cst_12 = arith.constant dense<0.000000e+00> : vector<8x128xf32>
    %33 = tpu.matmul %32, %1, %cst_12 {dimension_numbers = #tpu.dot_dimension_numbers<[1], [0], [0], [1], [0, 0, 1, 1], [], []>} : vector<8x48xf32>, vector<48x128xf32>, vector<8x128xf32> -> vector<8x128xf32>
    %34 = arith.maximumf %31, %33 : vector<8x128xf32>
    %35 = vector.extract_strided_slice %0 {offsets = [0, 160], sizes = [8, 48], strides = [1, 1]} : vector<8x256xf32> to vector<8x48xf32>
    %cst_13 = arith.constant dense<0.000000e+00> : vector<8x128xf32>
    %36 = tpu.matmul %35, %1, %cst_13 {dimension_numbers = #tpu.dot_dimension_numbers<[1], [0], [0], [1], [0, 0, 1, 1], [], []>} : vector<8x48xf32>, vector<48x128xf32>, vector<8x128xf32> -> vector<8x128xf32>
    %37 = arith.maximumf %34, %36 : vector<8x128xf32>
    %38 = vector.extract_strided_slice %0 {offsets = [0, 176], sizes = [8, 48], strides = [1, 1]} : vector<8x256xf32> to vector<8x48xf32>
    %cst_14 = arith.constant dense<0.000000e+00> : vector<8x128xf32>
    %39 = tpu.matmul %38, %1, %cst_14 {dimension_numbers = #tpu.dot_dimension_numbers<[1], [0], [0], [1], [0, 0, 1, 1], [], []>} : vector<8x48xf32>, vector<48x128xf32>, vector<8x128xf32> -> vector<8x128xf32>
    %40 = arith.maximumf %37, %39 : vector<8x128xf32>
    %41 = vector.extract_strided_slice %0 {offsets = [0, 192], sizes = [8, 48], strides = [1, 1]} : vector<8x256xf32> to vector<8x48xf32>
    %cst_15 = arith.constant dense<0.000000e+00> : vector<8x128xf32>
    %42 = tpu.matmul %41, %1, %cst_15 {dimension_numbers = #tpu.dot_dimension_numbers<[1], [0], [0], [1], [0, 0, 1, 1], [], []>} : vector<8x48xf32>, vector<48x128xf32>, vector<8x128xf32> -> vector<8x128xf32>
    %43 = arith.maximumf %40, %42 : vector<8x128xf32>
    %44 = vector.extract_strided_slice %0 {offsets = [0, 208], sizes = [8, 48], strides = [1, 1]} : vector<8x256xf32> to vector<8x48xf32>
    %cst_16 = arith.constant dense<0.000000e+00> : vector<8x128xf32>
    %45 = tpu.matmul %44, %1, %cst_16 {dimension_numbers = #tpu.dot_dimension_numbers<[1], [0], [0], [1], [0, 0, 1, 1], [], []>} : vector<8x48xf32>, vector<48x128xf32>, vector<8x128xf32> -> vector<8x128xf32>
    %46 = arith.maximumf %43, %45 : vector<8x128xf32>
    %47 = vector.extract_strided_slice %0 {offsets = [0, 224], sizes = [8, 32], strides = [1, 1]} : vector<8x256xf32> to vector<8x32xf32>
    %48 = vector.extract_strided_slice %1 {offsets = [0, 0], sizes = [32, 128], strides = [1, 1]} : vector<48x128xf32> to vector<32x128xf32>
    %cst_17 = arith.constant dense<0.000000e+00> : vector<8x128xf32>
    %49 = tpu.matmul %47, %48, %cst_17 {dimension_numbers = #tpu.dot_dimension_numbers<[1], [0], [0], [1], [0, 0, 1, 1], [], []>} : vector<8x32xf32>, vector<32x128xf32>, vector<8x128xf32> -> vector<8x128xf32>
    %50 = arith.maximumf %46, %49 : vector<8x128xf32>
    %c0_18 = arith.constant 0 : index
    %c0_19 = arith.constant 0 : index
    %51 = vector.load %arg3[%c0_18, %c0_19] : memref<1x128xf32, #tpu.memory_space<vmem>>, vector<1x128xf32>
    %52 = vector.broadcast %51 : vector<1x128xf32> to vector<8x128xf32>
    %53 = arith.addf %50, %52 : vector<8x128xf32>
    %cst_20 = arith.constant 0.000000e+00 : f32
    %54 = vector.broadcast %cst_20 : f32 to vector<8x128xf32>
    %55 = arith.maximumf %53, %54 : vector<8x128xf32>
    %c0_21 = arith.constant 0 : index
    %c0_22 = arith.constant 0 : index
    %56 = vector.load %arg4[%c0_21, %c0_22] : memref<8x128xf32, #tpu.memory_space<vmem>>, vector<8x128xf32>
    tpu.vector_store %arg4[%c0_21, %c0_22], %55 {strides = array<i32>} : memref<8x128xf32, #tpu.memory_space<vmem>>, vector<8x128xf32>,
    return
  }
  func.func @transform_0(%arg0: i32) -> (i32, i32) {
    %c0_i32 = arith.constant 0 : i32
    %c0_i32_0 = arith.constant 0 : i32
    return %arg0, %c0_i32 : i32, i32
  }
  func.func @transform_1(%arg0: i32) -> (i32, i32) {
    %c0_i32 = arith.constant 0 : i32
    %c0_i32_0 = arith.constant 0 : i32
    %c0_i32_1 = arith.constant 0 : i32
    return %c0_i32, %c0_i32_0 : i32, i32
  }
  func.func @transform_2(%arg0: i32) -> (i32, i32) {
    %c0_i32 = arith.constant 0 : i32
    %c0_i32_0 = arith.constant 0 : i32
    %c0_i32_1 = arith.constant 0 : i32
    return %c0_i32, %c0_i32_0 : i32, i32
  }
  func.func @transform_3(%arg0: i32) -> (i32, i32) {
    %c0_i32 = arith.constant 0 : i32
    %c0_i32_0 = arith.constant 0 : i32
    return %arg0, %c0_i32 : i32, i32
  }
}

</mosaic_0001>

<bundles_post_ra>
// kernel: tpu_custom_call.1
= control target key start
LH: loop header
LB: loop body
LE: loop exit
PB: predicated region body
PF: predicated region fallthrough
CT: control target
= control target key end

     0   :  { %8 = vsyncpa [#allocation3], 0  ;;  %s2636_s0 = inlined_call_operand.hbm [shape: f32[16,256], index: 0, kind: input, shape index: {}]   ;;  %s2637_s1 = inlined_call_operand.hbm [shape: f32[48,128], index: 1, kind: input, shape index: {}]   ;;  %s2638_s2 = inlined_call_operand.vmem [shape: f32[1,128], index: 2, kind: input, shape index: {}]   ;;  %s2639_s3 = inlined_call_operand.hbm [shape: f32[16,128], index: 3, kind: output, shape index: {}]  }
   0x1   :  { %10 = vsyncpa [#allocation3 + $0x1], 0 }
   0x2   :  { %11 = vsyncpa [#allocation6], 0 }
   0x3   :  { %12 = vsyncpa [#allocation4], 0 }
   0x4   :  { %14 = vsyncpa [#allocation4 + $0x1], 0  ;;  %s2261_s12 = smov 0   ;;  %s2263_s13 = smov 0  }
   0x5   :  { %s2265_s14 = smov 0   ;;  %s2267_s15 = smov 0  }
   0x6 LB: > { %s2282_s16 = sadd.s32 4294967295, %s2224_s15   ;;  %s1516_s17 = sadd.s32 4294967294, %s2224_s15   ;;  %s2224_s15 = sphi %s2267_s15, %s2659_s15   ;;  %s2220_s14 = sphi %s2265_s14, %s2658_s14   ;;  %s2216_s13 = sphi %s2263_s13, %s2657_s13   ;;  %s2212_s12 = sphi %s2261_s12, %s2656_s12  }
   0x7   : > { %p40_p0 = scmp.ne.s32.totalorder %s2216_s13, %s2212_s12  ;;  %p2640_p1 = scmp.eq.s32.totalorder %s2282_s16, 0 }
   0x8   : > { %p112_p3 = scmp.eq.s32.totalorder %s1516_s17, 1  ;;  %p1517_p5 = scmp.ge.s32.totalorder %s2224_s15, 1 }
   0x9   : > { %p2291_p4 = por %p2640_p1, %p40_p0  ;;  %p119_p7 = scmp.lt.s32.totalorder %s2224_s15, 3 }
   0xa   : > { %p2296_p6 = por %p112_p3, %p40_p0  ;;  %s2226_s21 = smov [#allocation5]  }
   0xb   : > { %s2643_s18 = scalar_select %p2291_p4, 1, 0 }
   0xc   : > { %s2644_s19 = scalar_select %p2296_p6, 1, 0 }
   0xd   : > { %p2301_p8 = pnand %p1517_p5, %p119_p7  ;;  %s131_s22 = sshll.u32 %s2226_s21, 4  ;;  %s2305_s22 = int_to_ptr.vmem [resolvable:$true] %s131_s22 }
   0xe   : > { %s2317_s24 = sadd.s32 1, %s2224_s15   ;;  %s27_s25 = sadd.s32 1, %s2220_s14 }
   0xf   : > { %s2645_s20 = scalar_select %p2301_p8, 1, 0 }
  0x10   : > { %p2035_p9 = pneg %p2301_p8  ;;  %s24_s26 = ssub.s32 %s2224_s15, %s2317_s24 }
  0x11   : > { %s2096_s29 = scalar_lea.hbm %s2637_s1, 768 }
  0x12   : > { %p2312_p11 = pnand %p2035_p9, %p2640_p1  ;;  %p2097_p12 = scmp.ne.s32.totalorder %s2637_s1, %s2096_s29 }
  0x13   : > { %p2103_p5 = scmp.lt.u32.totalorder %s2096_s29, %s2637_s1 }
  0x14   : > { %p2098_p13 = pneg %p2312_p11 }
  0x16   : > { %p2099_p0 = pnand %p2098_p13, %p2097_p12 }
  0x18   : > { %p2100_p3 = pneg %p2099_p0 }
  0x1a   : > { %p2105_p7 = pnand %p2103_p5, %p2100_p3 }
  0x1c   : > { %2108 = shalt.err (!%p2105_p7)
}
  0x1d   : > { %s2109_s7 = scalar_lea.vmem %s2305_s22, 768  ;;  %p2117_p2 = scmp.lt.s32.totalorder %s2305_s22, %s2305_s22 }
  0x1e   : > { %p2110_p9 = scmp.ne.s32.totalorder %s2305_s22, %s2109_s7  ;;  %p2118_p6 = scmp.lt.s32.totalorder %s2109_s7, %s2109_s7 }
  0x20   : > { %p2112_p10 = pnand %p2110_p9, %p2098_p13  ;;  %p2119_p4 = por %p2118_p6, %p2117_p2 }
  0x22   : > { %p2113_p1 = pneg %p2112_p10 }
  0x24   : > { %p2120_p8 = pnand %p2119_p4, %p2113_p1 }
  0x26   : > { %2123 = shalt.err (!%p2120_p8)
}
  0x27   : > { %s2227_s8 = smov 128   ;;  %s2228_s9 = smov 8  }
  0x28   : > { %2038 = dma.hbm_to_vmem [thread:$0]  (!%p2312_p11), %s2637_s1, 768, %s2305_s22, [#allocation6], %s2227_s8, %s2227_s8, %s2228_s9  }
  0x29   : > { %p25_p2 = scmp.eq.s32.totalorder %s24_s26, 0  ;;  %p34_p1 = scmp.ne.s32.totalorder %s2220_s14, %s2216_s13 }
  0x2a   : > { %p35_p4 = scmp.eq.s32.totalorder %s2224_s15, 0  ;;  %p2048_p6 = scmp.lt.s32.totalorder %s2224_s15, 2 }
  0x2b   : > { %s2348_s17 = scalar_select %p25_p2, %s2220_s14, %s27_s25  }
  0x2c   : > { %p36_p8 = por %p35_p4, %p34_p1  ;;  %p2647_p10 = scmp.eq.s32.totalorder %s2282_s16, 1 }
  0x2d   : > { %s148_s27 = sand.u32 1, %s2220_s14   ;;  %s1548_s28 = sshll.u32 %s2224_s15, 8 }
  0x2e   : > { %p2352_p12 = por %p2647_p10, %p34_p1  ;;  %s1520_s29 = sshll.u32 %s148_s27, 4 }
  0x2f   : > { %s2361_s4 = scalar_lea.hbm %s2636_s0, %s1548_s28  ;;  %s152_s22 = scalar_lea.vmem [#allocation2], %s1520_s29 }
  0x30   : > { %s160_s25 = sshll.u32 %s152_s22, 4  ;;  %p2363_p11 = pnand %p2048_p6, %p36_p8  ;;  %s2367_s25 = int_to_ptr.vmem [resolvable:$true] %s160_s25 }
  0x31   : > { %s149_s5 = scalar_lea.sflag [#allocation3], %s148_s27  ;;  %s2124_s6 = scalar_lea.hbm %s2361_s4, 256 }
  0x32   : > { %p2125_p13 = scmp.ne.s32.totalorder %s2361_s4, %s2124_s6  ;;  %p2126_p0 = pneg %p2363_p11 }
  0x33   : > { %s2129_s9 = scalar_lea.hbm %s2636_s0, 512  ;;  %p2130_p7 = scmp.lt.u32.totalorder %s2361_s4, %s2636_s0 }
  0x34   : > { %p2127_p3 = pnand %p2126_p0, %p2125_p13  ;;  %p2131_p9 = scmp.lt.u32.totalorder %s2129_s9, %s2124_s6 }
  0x35   : > { %p2133_p1 = scmp.lt.u32.totalorder %s2124_s6, %s2361_s4 }
  0x36   : > { %p2128_p5 = pneg %p2127_p3  ;;  %p2132_p2 = por %p2131_p9, %p2130_p7 }
  0x38   : > { %p2134_p4 = por %p2133_p1, %p2132_p2 }
  0x3a   : > { %p2135_p6 = pnand %p2134_p4, %p2128_p5 }
  0x3c   : > { %2138 = shalt.err (!%p2135_p6)
}
  0x3d   : > { %s2139_s27 = scalar_lea.vmem %s2367_s25, 256  ;;  %s2229_s28 = smov [#allocation2]  }
  0x3e   : > { %p2140_p8 = scmp.ne.s32.totalorder %s2367_s25, %s2139_s27  ;;  %s2144_s29 = sshll.u32 %s2229_s28, 4  ;;  %s2145_s29 = int_to_ptr.vmem [resolvable:$false] %s2144_s29 }
  0x3f   : > { %s2146_s23 = scalar_lea.vmem %s2145_s29, 512  ;;  %p2147_p3 = scmp.lt.s32.totalorder %s2367_s25, %s2145_s29 }
  0x40   : > { %p2142_p10 = pnand %p2140_p8, %p2126_p0  ;;  %p2148_p7 = scmp.lt.s32.totalorder %s2146_s23, %s2139_s27 }
  0x42   : > { %p2143_p13 = pneg %p2142_p10  ;;  %p2149_p9 = por %p2148_p7, %p2147_p3 }
  0x44   : > { %p2150_p2 = pnand %p2149_p9, %p2143_p13 }
  0x46   : > { %2153 = shalt.err (!%p2150_p2)
}
  0x47   : > { %2042 = dma.hbm_to_vmem [thread:$0]  (!%p2363_p11), %s2361_s4, 256, %s2367_s25, %s149_s5  }
  0x48   : > { %p2650_p5 = scmp.ne.s32.totalorder %s2645_s20, 0 }
  0x49   : > { %s2397_s30 = sand.u32 (!%p2650_p5), 1, %s2216_s13   ;;  %p2651_p0 = scmp.ne.s32.totalorder (!%p2650_p5), %s2643_s18, 0 }
  0x4a   : > { %169 = sbr.rel (%p2650_p5) target bundleno = 509 (0x1fd), region = 32  ;;  %s1524_s22 = sshll.u32 (!%p2650_p5), %s2397_s30, 4 }
  0x4b   : > { %s172_s6 = scalar_lea.sflag (!%p2650_p5), [#allocation3], %s2397_s30  ;;  %s2401_s7 = scalar_lea.vmem (!%p2650_p5), [#allocation2], %s1524_s22 }
  0x51   : > { %2199 = dma.done.wait (%p2651_p0), %s172_s6, 256  }
  0x52   : > { %2201 = vsyncadd (%p2651_p0), %s172_s6, 4294967040  ;;  %p2652_p11 = scmp.eq.s32.totalorder %s2282_s16, 0 }
  0x54   : > { %2203 = dma.done.wait (%p2652_p11), [#allocation6], 768   ;;  %p2653_p1 = pmov %p2652_p11 }
  0x55   : > { %v2230_v0 = vmov 0.0|0.0   ;;  %vm2231_vm0 = vmmov 0   ;;  %v2232_v1 = vmov 0.0   ;;  %v202_v2 = vld [vmem:[%s2401_s7] sm:$0xff]  ;;  %s2233_s18 = smov 112   ;;  %s2234_s20 = smov 80  }
  0x56   : > { %2205 = vsyncadd (%p2653_p1), [#allocation6], 4294966528  ;;  %1895 = vmatprep.subr.bf16.mxu1 %v2230_v0  ;;  %1889 = vmatprep.subr.bf16.mxu0 %v2230_v0  ;;  %v204_v3 = vld [vmem:[#allocation5] sm:$0xff]  ;;  %v205_v4 = vld [vmem:[#allocation5 + $0x8] sm:$0xff]  ;;  %s2235_s4 = smov 96   ;;  %s2236_s25 = smov 64  }
  0x57   : > { %1665 = vmatprep.mubr.msk.f32.mxu0 %vm2231_vm0, %v2232_v1  ;;  %1680 = vmatprep.mubr.msk.f32.mxu1 %vm2231_vm0, %v2232_v1  ;;  %v206_v5 = vld [vmem:[#allocation5 + $0x10] sm:$0xff]  ;;  %v207_v6 = vld [vmem:[#allocation5 + $0x18] sm:$0xff]  ;;  %v2420_v7 = vpack.c.bf16 %v205_v4, %v204_v3  ;;  %v208_v9 = vld [vmem:[#allocation5 + $0x20] sm:$0xff]  ;;  %vm210_vm1 = vcmask 261120   ;;  %s2237_s26 = smov 48   ;;  %s2238_s5 = smov 32  }
  0x58   : > { %358 = vrot.lane.b32.xlu0 %v202_v2, %s2233_s18  ;;  %508 = vrot.lane.b32.xlu1 %v202_v2, %s2234_s20  ;;  %v2422_v8 = vpack.c.bf16 %v207_v6, %v206_v5  ;;  %v209_v10 = vld [vmem:[#allocation5 + $0x28] sm:$0xff]  ;;  %vm284_vm2 = vcmask 392192   ;;  %s2239_s8 = smov 16   ;;  %vm816_vm3 = vcmask 130048   ;;  %s1526_s9 = sshll.u32 %s2397_s30, 3 }
  0x59   : > { %1897 = vmatpush3.bf16.msra.mxu1 %v2420_v7  ;;  %v2426_v11 = vpack.c.bf16 %v209_v10, %v208_v9  ;;  %v2436_v12 = vld [vmem:[%s2401_s7 + $0x8] sm:$0xff]  ;;  %s1545_s27 = sshll.u32 %s2282_s16, 7  ;;  %s201_s28 = scalar_lea.vmem [#allocation7], %s1526_s9 }
  0x5a   : > { %1891 = vmatpush3.bf16.msra.mxu0 %v2422_v8  ;;  %1898 = vmatprep.subr.bf16.mxu1 %v2230_v0  ;;  %s1436_s29 = sshll.u32 %s201_s28, 4  ;;  %s2592_s6 = scalar_lea.hbm %s2639_s3, %s1545_s27  ;;  %s2594_s29 = int_to_ptr.vmem [resolvable:$true] %s1436_s29 }
  0x5b   : > { %1892 = vmatprep.subr.bf16.mxu0 %v2230_v0  ;;  %s1423_s7 = scalar_lea.sflag [#allocation4], %s2397_s30  ;;  %s2240_s16 = smov [#allocation7]  }
  0x5c   : > { %433 = vrot.lane.b32.xlu0 %v202_v2, %s2235_s4  ;;  %583 = vrot.lane.b32.xlu1 %v202_v2, %s2236_s25 }
  0x5d   : > { %1900 = vmatpush3.bf16.msra.mxu1 %v2422_v8 }
  0x5e   : > { %1894 = vmatpush3.bf16.msra.mxu0 %v2426_v11  ;;  %1901 = vmatprep.subr.bf16.mxu1 %v2230_v0 }
  0x5f   : > { %1904 = vmatprep.subr.bf16.mxu0 %v2230_v0 }
  0x60   : > { %658 = vrot.lane.b32.xlu0 %v202_v2, %s2237_s26  ;;  %734 = vrot.lane.b32.xlu1 %v202_v2, %s2238_s5 }
  0x61   : > { %1666 = vmatmul.mubr.msk.f32.vlgmr.msra.gmra.mrb[0].mxu0 %vm210_vm1, %v202_v2  ;;  %1903 = vmatpush3.bf16.msra.mxu1 %v2426_v11 }
  0x62   : > { %1906 = vmatpush3.bf16.msra.mxu0 %v2420_v7  ;;  %1913 = vmatprep.subr.bf16.mxu1 %v2230_v0 }
  0x63   : > { %1907 = vmatprep.subr.bf16.mxu0 %v2230_v0  ;;  %1695 = vmatprep.mubr.msk.f32.mxu0 %vm2231_vm0, %v2232_v1 }
  0x64   : > { %736 = vrot.lane.b32.xlu0 %v2436_v12, %s2238_s5  ;;  %812 = vrot.lane.b32.xlu1 %v202_v2, %s2239_s8 }
  0x65   : > { %1681 = vmatmul.mubr.msk.f32.vlgmr.msra.gmra.mrb[0].mxu1 %vm284_vm2, %v202_v2 }
  0x66   : > { %1909 = vmatpush3.bf16.msra.mxu0 %v2422_v8  ;;  %1915 = vmatpush3.bf16.msra.mxu1 %v2420_v7 }
  0x67   : > { %1910 = vmatprep.subr.bf16.mxu0 %v2230_v0  ;;  %1916 = vmatprep.subr.bf16.mxu1 %v2230_v0 }
  0x68   : > { %814 = vrot.lane.b32.xlu0 %v2436_v12, %s2239_s8  ;;  %964 = vrot.lane.b32.xlu1 %v2436_v12, %s2233_s18  ;;  %s2154_s18 = scalar_lea.vmem %s2594_s29, 128 }
  0x69   : > { %1710 = vmatprep.mubr.msk.f32.mxu1 %vm2231_vm0, %v2232_v1  ;;  %p2155_p4 = scmp.ne.s32.totalorder %s2594_s29, %s2154_s18 }
  0x6a   : > { %1912 = vmatpush3.bf16.msra.mxu0 %v2426_v11  ;;  %1918 = vmatpush3.bf16.msra.mxu1 %v2422_v8 }
  0x6b   : > { %1919 = vmatprep.subr.bf16.mxu1 %v2230_v0  ;;  %1922 = vmatprep.subr.bf16.mxu0 %v2230_v0  ;;  %p2156_p6 = pnand %p2155_p4, %p2352_p12 }
  0x6c   : > { %1039 = vrot.lane.b32.xlu0 %v2436_v12, %s2235_s4  ;;  %1114 = vrot.lane.b32.xlu1 %v2436_v12, %s2234_s20  ;;  %s2158_s20 = sshll.u32 %s2240_s16, 4  ;;  %s2159_s20 = int_to_ptr.vmem [resolvable:$false] %s2158_s20 }
  0x6d   : > { %p2157_p8 = pneg %p2156_p6  ;;  %s2160_s4 = scalar_lea.vmem %s2159_s20, 256 }
  0x6e   : > { %1921 = vmatpush3.bf16.msra.mxu1 %v2426_v11  ;;  %p2161_p10 = scmp.lt.s32.totalorder %s2594_s29, %s2159_s20  ;;  %p2162_p13 = scmp.lt.s32.totalorder %s2160_s4, %s2154_s18 }
  0x6f   : > { %1931 = vmatprep.subr.bf16.mxu1 %v2230_v0 }
  0x70   : > { %1189 = vrot.lane.b32.xlu0 %v2436_v12, %s2236_s25  ;;  %1264 = vrot.lane.b32.xlu1 %v2436_v12, %s2237_s26  ;;  %p2163_p3 = por %p2162_p13, %p2161_p10 }
  0x72   : > { %p2164_p7 = pnand %p2163_p3, %p2157_p8 }
  0xca   : > { %v359_v13 = vpop.permute.xlu0 %358  ;;  %v509_v15 = vpop.permute.xlu1 %508 }
  0xcb   : > { %1696 = vmatmul.mubr.msk.f32.vlgmr.msra.gmra.mrb[2].mxu0 %vm284_vm2, %v359_v13 }
  0xcc   : > { %1924 = vmatpush3.bf16.msra.mxu0 %v2420_v7  ;;  %1725 = vmatprep.mubr.msk.f32.mxu0 %vm2231_vm0, %v2232_v1 }
  0xcd   : > { %1925 = vmatprep.subr.bf16.mxu0 %v2230_v0 }
  0xce   : > { %v434_v14 = vpop.permute.xlu0 %433  ;;  %v584_v16 = vpop.permute.xlu1 %583 }
  0xcf   : > { %1711 = vmatmul.mubr.msk.f32.vlgmr.msra.gmra.mrb[2].mxu1 %vm284_vm2, %v434_v14 }
  0xd0   : > { %1927 = vmatpush3.bf16.msra.mxu0 %v2422_v8  ;;  %1933 = vmatpush3.bf16.msra.mxu1 %v2420_v7 }
  0xd1   : > { %1928 = vmatprep.subr.bf16.mxu0 %v2230_v0  ;;  %1934 = vmatprep.subr.bf16.mxu1 %v2230_v0 }
  0xd2   : > { %1740 = vmatprep.mubr.msk.f32.mxu1 %vm2231_vm0, %v2232_v1  ;;  %v659_v17 = vpop.permute.xlu0 %658  ;;  %v735_v18 = vpop.permute.xlu1 %734 }
  0xd4   : > { %1930 = vmatpush3.bf16.msra.mxu0 %v2426_v11  ;;  %1936 = vmatpush3.bf16.msra.mxu1 %v2422_v8 }
  0xd5   : > { %1937 = vmatprep.subr.bf16.mxu1 %v2230_v0  ;;  %1940 = vmatprep.subr.bf16.mxu0 %v2230_v0 }
  0xd6   : > { %v2506_v19 = vpop.permute.xlu0 %736  ;;  %v813_v21 = vpop.permute.xlu1 %812 }
  0xd7   : > { %1726 = vmatmul.mubr.msk.f32.vlgmr.msra.gmra.mrb[4].mxu0 %vm284_vm2, %v509_v15  ;;  %v738_v20 = vsel %vm210_vm1, %v735_v18, %v2506_v19 }
  0xd8   : > { %1939 = vmatpush3.bf16.msra.mxu1 %v2426_v11  ;;  %1942 = vmatpush3.bf16.msra.mxu0 %v2420_v7 }
  0xd9   : > { %1943 = vmatprep.subr.bf16.mxu0 %v2230_v0  ;;  %1949 = vmatprep.subr.bf16.mxu1 %v2230_v0 }
  0xda   : > { %1755 = vmatprep.mubr.msk.f32.mxu0 %vm2231_vm0, %v2232_v1  ;;  %v815_v22 = vpop.permute.xlu0 %814  ;;  %v965_v24 = vpop.permute.xlu1 %964 }
  0xdb   : > { %1741 = vmatmul.mubr.msk.f32.vlgmr.msra.gmra.mrb[4].mxu1 %vm284_vm2, %v584_v16  ;;  %v817_v23 = vsel %vm816_vm3, %v813_v21, %v815_v22 }
  0xdc   : > { %1945 = vmatpush3.bf16.msra.mxu0 %v2422_v8  ;;  %1951 = vmatpush3.bf16.msra.mxu1 %v2420_v7 }
  0xdd   : > { %1946 = vmatprep.subr.bf16.mxu0 %v2230_v0  ;;  %1952 = vmatprep.subr.bf16.mxu1 %v2230_v0 }
  0xde   : > { %1770 = vmatprep.mubr.msk.f32.mxu1 %vm2231_vm0, %v2232_v1  ;;  %v1040_v25 = vpop.permute.xlu0 %1039  ;;  %v1115_v26 = vpop.permute.xlu1 %1114 }
  0xe0   : > { %1948 = vmatpush3.bf16.msra.mxu0 %v2426_v11  ;;  %1954 = vmatpush3.bf16.msra.mxu1 %v2422_v8 }
  0xe1   : > { %1955 = vmatprep.subr.bf16.mxu1 %v2230_v0  ;;  %1958 = vmatprep.subr.bf16.mxu0 %v2230_v0 }
  0xe2   : > { %v1190_v27 = vpop.permute.xlu0 %1189  ;;  %v1265_v28 = vpop.permute.xlu1 %1264 }
  0xe3   : > { %1756 = vmatmul.mubr.msk.f32.vlgmr.msra.gmra.mrb[6].mxu0 %vm284_vm2, %v659_v17 }
  0xe4   : > { %1957 = vmatpush3.bf16.msra.mxu1 %v2426_v11  ;;  %1960 = vmatpush3.bf16.msra.mxu0 %v2420_v7 }
  0xe5   : > { %1961 = vmatprep.subr.bf16.mxu0 %v2230_v0  ;;  %1967 = vmatprep.subr.bf16.mxu1 %v2230_v0 }
  0xe6   : > { %1785 = vmatprep.mubr.msk.f32.mxu0 %vm2231_vm0, %v2232_v1 }
  0xe7   : > { %1771 = vmatmul.mubr.msk.f32.vlgmr.msra.gmra.mrb[6].mxu1 %vm284_vm2, %v738_v20 }
  0xe8   : > { %1963 = vmatpush3.bf16.msra.mxu0 %v2422_v8  ;;  %1969 = vmatpush3.bf16.msra.mxu1 %v2420_v7 }
  0xe9   : > { %1964 = vmatprep.subr.bf16.mxu0 %v2230_v0  ;;  %1970 = vmatprep.subr.bf16.mxu1 %v2230_v0 }
  0xea   : > { %1800 = vmatprep.mubr.msk.f32.mxu1 %vm2231_vm0, %v2232_v1 }
  0xec   : > { %1966 = vmatpush3.bf16.msra.mxu0 %v2426_v11  ;;  %1972 = vmatpush3.bf16.msra.mxu1 %v2422_v8 }
  0xed   : > { %1973 = vmatprep.subr.bf16.mxu1 %v2230_v0  ;;  %1976 = vmatprep.subr.bf16.mxu0 %v2230_v0 }
  0xef   : > { %1786 = vmatmul.mubr.msk.f32.vlgmr.msra.gmra.mrb[8].mxu0 %vm284_vm2, %v817_v23 }
  0xf0   : > { %1975 = vmatpush3.bf16.msra.mxu1 %v2426_v11  ;;  %1978 = vmatpush3.bf16.msra.mxu0 %v2420_v7 }
  0xf1   : > { %1979 = vmatprep.subr.bf16.mxu0 %v2230_v0  ;;  %1985 = vmatprep.subr.bf16.mxu1 %v2230_v0 }
  0xf2   : > { %1815 = vmatprep.mubr.msk.f32.mxu0 %vm2231_vm0, %v2232_v1 }
  0xf3   : > { %1801 = vmatmul.mubr.msk.f32.vlgmr.msra.gmra.mrb[8].mxu1 %vm284_vm2, %v2436_v12 }
  0xf4   : > { %1981 = vmatpush3.bf16.msra.mxu0 %v2422_v8  ;;  %1987 = vmatpush3.bf16.msra.mxu1 %v2420_v7 }
  0xf5   : > { %1982 = vmatprep.subr.bf16.mxu0 %v2230_v0  ;;  %1988 = vmatprep.subr.bf16.mxu1 %v2230_v0 }
  0xf6   : > { %1830 = vmatprep.mubr.msk.f32.mxu1 %vm2231_vm0, %v2232_v1 }
  0xf8   : > { %1984 = vmatpush3.bf16.msra.mxu0 %v2426_v11  ;;  %1990 = vmatpush3.bf16.msra.mxu1 %v2422_v8 }
  0xf9   : > { %1991 = vmatprep.subr.bf16.mxu1 %v2230_v0  ;;  %1994 = vmatprep.subr.bf16.mxu0 %v2230_v0 }
  0xfb   : > { %1816 = vmatmul.mubr.msk.f32.vlgmr.msra.gmra.mrb[10].mxu0 %vm284_vm2, %v965_v24 }
  0xfc   : > { %1993 = vmatpush3.bf16.msra.mxu1 %v2426_v11  ;;  %1996 = vmatpush3.bf16.msra.mxu0 %v2420_v7 }
  0xfd   : > { %1997 = vmatprep.subr.bf16.mxu0 %v2230_v0  ;;  %2003 = vmatprep.subr.bf16.mxu1 %v2230_v0 }
  0xfe   : > { %1845 = vmatprep.mubr.msk.f32.mxu0 %vm2231_vm0, %v2232_v1 }
  0xff   : > { %1831 = vmatmul.mubr.msk.f32.vlgmr.msra.gmra.mrb[10].mxu1 %vm284_vm2, %v1040_v25 }
 0x100   : > { %1999 = vmatpush3.bf16.msra.mxu0 %v2422_v8  ;;  %2005 = vmatpush3.bf16.msra.mxu1 %v2420_v7 }
 0x101   : > { %2000 = vmatprep.subr.bf16.mxu0 %v2230_v0  ;;  %2006 = vmatprep.subr.bf16.mxu1 %v2230_v0 }
 0x102   : > { %1860 = vmatprep.mubr.msk.f32.mxu1 %vm2231_vm0, %v2232_v1 }
 0x104   : > { %2002 = vmatpush3.bf16.msra.mxu0 %v2426_v11  ;;  %2008 = vmatpush3.bf16.msra.mxu1 %v2422_v8 }
 0x105   : > { %2009 = vmatprep.subr.bf16.mxu1 %v2230_v0  ;;  %2012 = vmatprep.subr.bf16.mxu0 %v2230_v0 }
 0x107   : > { %1846 = vmatmul.mubr.msk.f32.vlgmr.msra.gmra.mrb[12].mxu0 %vm284_vm2, %v1115_v26 }
 0x108   : > { %2011 = vmatpush3.bf16.msra.mxu1 %v2426_v11  ;;  %2014 = vmatpush3.bf16.msra.mxu0 %v2420_v7 }
 0x109   : > { %2015 = vmatprep.subr.bf16.mxu0 %v2230_v0  ;;  %2021 = vmatprep.subr.bf16.mxu1 %v2230_v0 }
 0x10a   : > { %1875 = vmatprep.mubr.msk.f32.mxu0 %vm2231_vm0, %v2232_v1 }
 0x10b   : > { %1861 = vmatmul.mubr.msk.f32.vlgmr.msra.gmra.mrb[12].mxu1 %vm284_vm2, %v1190_v27 }
 0x10c   : > { %2017 = vmatpush3.bf16.msra.mxu0 %v2422_v8  ;;  %2023 = vmatpush3.bf16.msra.mxu1 %v2420_v7 }
 0x10d   : > { %2018 = vmatprep.subr.bf16.mxu0 %v2230_v0  ;;  %2024 = vmatprep.subr.bf16.mxu1 %v2230_v0 }
 0x10e   : > { %1886 = vmatprep.mubr.msk.f32.mxu1 %vm2231_vm0, %v2232_v1 }
 0x110   : > { %2020 = vmatpush3.bf16.msra.mxu0 %v2426_v11  ;;  %2026 = vmatpush3.bf16.msra.mxu1 %v2422_v8  ;;  %v1543_v11 = vld [vmem:[%s2638_s2] ss:$0 sm:$0xff] }
 0x113   : > { %1876 = vmatmul.mubr.msk.f32.vlgmr.msra.gmra.mrb[14].mxu0 %vm284_vm2, %v1265_v28  ;;  %1887 = vmatmul.mubr.msk.f32.vlgmr.msra.gmra.mrb[14].mxu1 %vm210_vm1, %v2506_v19 }
 0x134   : > { %v280_v29 = vpop.f32.mrb[0].mxu0 }
 0x135   : > { %v1667_v30 = vpop.f32.mrb[1].mxu0 }
 0x138   : > { %v353_v31 = vpop.f32.mrb[0].mxu1 }
 0x139   : > { %v357_v32 = vmax.f32 %v280_v29, %v353_v31  ;;  %v1682_v33 = vpop.f32.mrb[1].mxu1 }
 0x19e   : > { %v428_v34 = vpop.f32.mrb[2].mxu0 }
 0x19f   : > { %v432_v35 = vmax.f32 %v357_v32, %v428_v34  ;;  %v1697_v36 = vpop.f32.mrb[3].mxu0 }
 0x1a2   : > { %v503_v37 = vpop.f32.mrb[2].mxu1 }
 0x1a3   : > { %v507_v38 = vmax.f32 %v432_v35, %v503_v37  ;;  %v1712_v39 = vpop.f32.mrb[3].mxu1 }
 0x1aa   : > { %v578_v40 = vpop.f32.mrb[4].mxu0 }
 0x1ab   : > { %v582_v41 = vmax.f32 %v507_v38, %v578_v40  ;;  %v1727_v42 = vpop.f32.mrb[5].mxu0 }
 0x1ae   : > { %v653_v43 = vpop.f32.mrb[4].mxu1 }
 0x1af   : > { %v657_v44 = vmax.f32 %v582_v41, %v653_v43  ;;  %v1742_v45 = vpop.f32.mrb[5].mxu1 }
 0x1b6   : > { %v728_v46 = vpop.f32.mrb[6].mxu0 }
 0x1b7   : > { %v732_v47 = vmax.f32 %v657_v44, %v728_v46  ;;  %v1757_v48 = vpop.f32.mrb[7].mxu0 }
 0x1ba   : > { %v807_v49 = vpop.f32.mrb[6].mxu1 }
 0x1bb   : > { %v811_v50 = vmax.f32 %v732_v47, %v807_v49  ;;  %v1772_v51 = vpop.f32.mrb[7].mxu1 }
 0x1c2   : > { %v886_v52 = vpop.f32.mrb[8].mxu0 }
 0x1c3   : > { %v890_v53 = vmax.f32 %v811_v50, %v886_v52  ;;  %v1787_v54 = vpop.f32.mrb[9].mxu0 }
 0x1c6   : > { %v959_v55 = vpop.f32.mrb[8].mxu1 }
 0x1c7   : > { %v963_v56 = vmax.f32 %v890_v53, %v959_v55  ;;  %v1802_v57 = vpop.f32.mrb[9].mxu1 }
 0x1ce   : > { %v1034_v58 = vpop.f32.mrb[10].mxu0 }
 0x1cf   : > { %v1038_v59 = vmax.f32 %v963_v56, %v1034_v58  ;;  %v1817_v60 = vpop.f32.mrb[11].mxu0 }
 0x1d2   : > { %v1109_v61 = vpop.f32.mrb[10].mxu1 }
 0x1d3   : > { %v1113_v62 = vmax.f32 %v1038_v59, %v1109_v61  ;;  %v1832_v63 = vpop.f32.mrb[11].mxu1 }
 0x1da   : > { %v1184_v0 = vpop.f32.mrb[12].mxu0 }
 0x1db   : > { %v1188_v1 = vmax.f32 %v1113_v62, %v1184_v0  ;;  %v1847_v2 = vpop.f32.mrb[13].mxu0 }
 0x1de   : > { %v1259_v3 = vpop.f32.mrb[12].mxu1 }
 0x1df   : > { %v1263_v4 = vmax.f32 %v1188_v1, %v1259_v3  ;;  %v1862_v5 = vpop.f32.mrb[13].mxu1 }
 0x1e6   : > { %v1334_v6 = vpop.f32.mrb[14].mxu0  ;;  %v1407_v7 = vpop.f32.mrb[14].mxu1 }
 0x1e7   : > { %v1338_v8 = vmax.f32 %v1263_v4, %v1334_v6  ;;  %v1877_v9 = vpop.f32.mrb[15].mxu0  ;;  %v1888_v10 = vpop.f32.mrb[15].mxu1 }
 0x1e9   : > { %v1411_v12 = vmax.f32 %v1338_v8, %v1407_v7 }
 0x1eb   : > { %v1419_v13 = vadd.f32 %v1543_v11, %v1411_v12 }
 0x1ed   : > { %v1420_v14 = vmax.f32 %v1419_v13, 0.0 }
 0x1ef   : > { %1421 = vst [vmem:[%s201_s28] sm:$0xff] %v1420_v14 }
 0x1f0   : > { %2167 = shalt.err (!%p2164_p7)
}
 0x1f1   : > { %s2168_s30 = scalar_lea.hbm %s2592_s6, 128  ;;  %s2172_s5 = scalar_lea.hbm %s2639_s3, 256 }
 0x1f2   : > { %p2169_p9 = scmp.ne.s32.totalorder %s2592_s6, %s2168_s30  ;;  %p2173_p0 = scmp.lt.u32.totalorder %s2592_s6, %s2639_s3 }
 0x1f3   : > { %p2174_p11 = scmp.lt.u32.totalorder %s2172_s5, %s2168_s30  ;;  %p2176_p4 = scmp.lt.u32.totalorder %s2168_s30, %s2592_s6 }
 0x1f4   : > { %p2170_p2 = pnand %p2169_p9, %p2352_p12 }
 0x1f5   : > { %p2175_p1 = por %p2174_p11, %p2173_p0 }
 0x1f6   : > { %p2171_p5 = pneg %p2170_p2 }
 0x1f7   : > { %p2177_p6 = por %p2176_p4, %p2175_p1 }
 0x1f9   : > { %p2178_p8 = pnand %p2177_p6, %p2171_p5 }
 0x1fb   : > { %2181 = shalt.err (!%p2178_p8)
}
 0x1fc   : > { %2033 = dma.vmem_to_hbm [thread:$0]  (%p2352_p12), %s2594_s29, 128, %s2592_s6, %s1423_s7  }
 0x1fd PF: > { %s1448_s10 = sand.u32 1, %s2212_s12   ;;  %p2654_p10 = scmp.ne.s32.totalorder %s2644_s19, 0 }
 0x1fe   : > { %p2655_p13 = scmp.ge.s32.totalorder %s2224_s15, 2  ;;  %s1449_s11 = scalar_lea.sflag [#allocation4], %s1448_s10 }
 0x200   : > { %p2044_p3 = pnand %p2655_p13, %p2654_p10 }
 0x202   : > { %2207 = dma.done.wait (!%p2044_p3), %s1449_s11, 128  }
 0x203   : > { %2209 = vsyncadd (!%p2044_p3), %s1449_s11, 4294967168  ;;  %p17_p7 = scmp.ge.s32.totalorder %s2317_s24, 4   ;;  %s2656_s12 = smov %s2216_s13 }
 0x204   : > { %s2657_s13 = smov %s2220_s14  ;;  %s2658_s14 = smov %s2348_s17 }
 0x205   : > { %s2659_s15 = smov %s2317_s24  ;;  %19 = sbr.rel (!%p17_p7) target bundleno = 6 (0x6), region = 81 }
 0x20c   :  { %1454 = vsyncpa [#allocation3], 1 }
 0x20d   :  { %1456 = vsyncpa [#allocation3 + $0x1], 1 }
 0x20e   :  { %1457 = vsyncpa [#allocation6], 1 }
 0x20f   :  { %1458 = vsyncpa [#allocation4], 1 }
 0x210   :  { %1460 = vsyncpa [#allocation4 + $0x1], 1 }

</bundles_post_ra>
